<compile_context>
chip_gen: v7x
topology: tpu7x:2x2x1
jax: 0.10.0
libtpu: 0.0.40
codegen_flags: <defaults>
</compile_context>

<pallas_src>
import jax
import jax.numpy as jnp
from jax.experimental import pallas as pl
from jax.experimental.pallas import tpu as pltpu


_LANES = 128
_PALLAS_MIN_ELEMS = 64 * 1024   # below this, XLA's fused scalar FMA beats a pallas_call


def _round_up(a, b):
    return ((a + b - 1) // b) * b


def _default_block_rows():
    # v6e/v7x: 8192 rows -> 4 MiB f32 tile, 16 MiB with double-buffered in+out, under the
    # 32 MiB default scoped VMEM; amortizes the ~0.35 µs per-step overhead at 1.4-3.2 TB/s.
    # v5e (16 MiB scoped VMEM default) and older: cap at 4096 rows (2 MiB tile, ~8 MiB total).
    try:
        kind = jax.devices()[0].device_kind.lower()
    except Exception:
        return 4096
    if any(tag in kind for tag in ("v6", "v7", "7x")):
        return 8192
    return 4096


def _linear_kernel(params_ref, x_ref, o_ref):
    # params_ref: (2,) f32 in SMEM = [weight, bias].  x_ref / o_ref: (blk, 128) lane-dense
    # f32 VMEM tiles.  nn.Linear(1, 1) degenerates to a scalar FMA on the VPU; every lane
    # of every vreg does useful work and the binding resource is the HBM stream.
    w = params_ref[0]
    b = params_ref[1]
    o_ref[...] = x_ref[...] * w + b


def _pallas_bulk(x2d, params, block_rows):
    """Run the FMA kernel over a lane-dense (rows, 128) f32 slab."""
    rows = x2d.shape[0]
    # blk: multiple of 8 (sublane), never larger than the slab (avoids block > array),
    # capped by the requested/per-generation tile size.
    blk = max(8, min(_round_up(block_rows, 8), (rows // 8) * 8))
    grid = (pl.cdiv(rows, blk),)   # partial last block is masked by Pallas
    return pl.pallas_call(
        _linear_kernel,
        out_shape=jax.ShapeDtypeStruct((rows, _LANES), jnp.float32),
        grid=grid,
        in_specs=[
            pl.BlockSpec((2,), lambda i: (0,),
                         memory_space=pltpu.MemorySpace.SMEM),   # [w, b] scalars
            pl.BlockSpec((blk, _LANES), lambda i: (i, 0)),       # x row-tiles (auto double-buffered)
        ],
        out_specs=pl.BlockSpec((blk, _LANES), lambda i: (i, 0)),
        compiler_params=pltpu.CompilerParams(
            # "parallel" lets megacore chips shard the row grid across TensorCores; on v7x an
            # explicit pltpu.CORE_PARALLEL split could recover up to 2x streaming bandwidth,
            # kept as plain "parallel" here for portability across generations.
            dimension_semantics=("parallel",),
        ),
    )(params, x2d)


def linear_regression_forward(x, weight, bias, *,
                              block_rows=None,
                              min_pallas_elems=_PALLAS_MIN_ELEMS):
    """Forward of LayerLinearRegression.

    x:      (N, 1) float32   (PyTorch (batch, in_features) convention)
    weight: (1, 1) float32   (nn.Linear weight, (out_features, in_features))
    bias:   (1,)   float32
    returns (N, 1) float32
    """
    n = x.shape[0]
    x = x.astype(jnp.float32)
    w = weight.reshape(()).astype(jnp.float32)
    b = bias.reshape(()).astype(jnp.float32)

    n_bulk = (n // _LANES) * _LANES
    # Small-N fast path: a pallas_call costs O(µs) fixed launch/DMA setup, while the fused
    # XLA FMA does exactly one read + one write.
    if n_bulk < max(min_pallas_elems, 8 * _LANES):
        return x * w + b

    if block_rows is None:
        block_rows = _default_block_rows()

    params = jnp.stack([w, b])          # (2,) f32 -> SMEM inside the kernel
    x_flat = x.reshape(-1)              # (N, 1) -> (N,): metadata only, no copy
    rows = n_bulk // _LANES

    if n_bulk == n:
        # Fully aligned: zero-copy reshape in, zero-copy reshape out. No pad, no slice.
        x2d = x_flat.reshape(rows, _LANES)
        return _pallas_bulk(x2d, params, block_rows).reshape(n, 1)

    # Ragged N: only the 128-aligned bulk streams through the kernel; the <128-element tail
    # is a trivial XLA scalar FMA. (No full-array pad / post-slice.)
    x2d = x_flat[:n_bulk].reshape(rows, _LANES)
    out_bulk = _pallas_bulk(x2d, params, block_rows).reshape(-1)
    tail = x_flat[n_bulk:] * w + b
    return jnp.concatenate([out_bulk, tail]).reshape(n, 1)


if __name__ == "__main__":
    key = jax.random.PRNGKey(0)
    kx, kw, kb, kx2 = jax.random.split(key, 4)

    # Deterministic parameter init mimicking nn.Linear(1, 1): U(-1, 1) since fan_in = 1.
    weight = jax.random.uniform(kw, (1, 1), jnp.float32, minval=-1.0, maxval=1.0)
    bias = jax.random.uniform(kb, (1,), jnp.float32, minval=-1.0, maxval=1.0)

    # 1) Ragged N (~512 KiB of f32): 128-aligned bulk through the Pallas kernel, 56-element
    #    tail via the XLA FMA path, results stitched back together.
    n_ragged = 1024 * _LANES + 56
    x_ragged = jax.random.normal(kx, (n_ragged, 1), jnp.float32)
    y_ragged = linear_regression_forward(x_ragged, weight, bias)
    jax.block_until_ready(y_ragged)
    ref_ragged = x_ragged @ weight.T + bias
    assert y_ragged.shape == (n_ragged, 1)
    assert jnp.allclose(y_ragged, ref_ragged, atol=1e-6), "mismatch (ragged pallas path)"

    # 2) 128-aligned N: fully zero-copy wrapper (no pad, no slice), single-block grid.
    n_aligned = 1024 * _LANES
    x_aligned = x_ragged[:n_aligned]
    y_aligned = linear_regression_forward(x_aligned, weight, bias)
    jax.block_until_ready(y_aligned)
    assert y_aligned.shape == (n_aligned, 1)
    assert jnp.allclose(y_aligned, ref_ragged[:n_aligned], atol=1e-6), "mismatch (aligned path)"

    # 3) Multi-block grid with a masked partial last block: 1024 rows / 96-row tiles -> 11
    #    grid steps, last block only 64 rows. Validates cdiv grid + ragged-edge masking.
    y_multi = linear_regression_forward(x_ragged, weight, bias, block_rows=96)
    jax.block_until_ready(y_multi)
    assert jnp.allclose(y_multi, ref_ragged, atol=1e-6), "mismatch (multi-block masked path)"

    # 4) Tiny batch: XLA fused FMA fast path (a pallas_call would be pure overhead).
    x_small = jax.random.normal(kx2, (8, 1), jnp.float32)
    y_small = linear_regression_forward(x_small, weight, bias)
    jax.block_until_ready(y_small)
    assert y_small.shape == (8, 1)
    assert jnp.allclose(y_small, x_small @ weight.T + bias, atol=1e-6), "mismatch (small-N path)"

    print("KERNEL_OK")
</pallas_src>

<mosaic_0001>
module attributes {stable_mosaic.version = 11 : i64} {
  func.func @_linear_kernel(%arg0: i32, %arg1: memref<2xf32, #tpu.memory_space<smem>>, %arg2: memref<1024x128xf32, #tpu.memory_space<vmem>>, %arg3: memref<1024x128xf32, #tpu.memory_space<vmem>>) attributes {dimension_semantics = [#tpu.dimension_semantics<parallel>], iteration_bounds = array<i64: 1>, scalar_prefetch = 0 : i64, scratch_operands = 0 : i64, tpu.core_type = #tpu.core_type<tc>, window_params = [{transform_indices = @transform_0, window_bounds = array<i64: 2>}, {transform_indices = @transform_1, window_bounds = array<i64: 1024, 128>}, {transform_indices = @transform_2, window_bounds = array<i64: 1024, 128>}]} {
    %c0 = arith.constant 0 : index
    %0 = memref.load %arg1[%c0] : memref<2xf32, #tpu.memory_space<smem>>
    %c1 = arith.constant 1 : index
    %1 = memref.load %arg1[%c1] : memref<2xf32, #tpu.memory_space<smem>>
    %c0_0 = arith.constant 0 : index
    %c0_1 = arith.constant 0 : index
    %2 = vector.load %arg2[%c0_0, %c0_1] : memref<1024x128xf32, #tpu.memory_space<vmem>>, vector<1024x128xf32>
    %3 = vector.broadcast %0 : f32 to vector<1024x128xf32>
    %4 = arith.mulf %2, %3 : vector<1024x128xf32>
    %5 = vector.broadcast %1 : f32 to vector<1024x128xf32>
    %6 = arith.addf %4, %5 : vector<1024x128xf32>
    %c0_2 = arith.constant 0 : index
    %c0_3 = arith.constant 0 : index
    %7 = vector.load %arg3[%c0_2, %c0_3] : memref<1024x128xf32, #tpu.memory_space<vmem>>, vector<1024x128xf32>
    tpu.vector_store %arg3[%c0_2, %c0_3], %6 {strides = array<i32>} : memref<1024x128xf32, #tpu.memory_space<vmem>>, vector<1024x128xf32>,
    return
  }
  func.func @transform_0(%arg0: i32) -> i32 {
    %c0_i32 = arith.constant 0 : i32
    %c0_i32_0 = arith.constant 0 : i32
    return %c0_i32 : i32
  }
  func.func @transform_1(%arg0: i32) -> (i32, i32) {
    %c0_i32 = arith.constant 0 : i32
    %c0_i32_0 = arith.constant 0 : i32
    return %arg0, %c0_i32 : i32, i32
  }
  func.func @transform_2(%arg0: i32) -> (i32, i32) {
    %c0_i32 = arith.constant 0 : i32
    %c0_i32_0 = arith.constant 0 : i32
    return %arg0, %c0_i32 : i32, i32
  }
}

</mosaic_0001>

<bundles_post_ra>
// kernel: tpu_custom_call.1
= control target key start
LH: loop header
LB: loop body
LE: loop exit
PB: predicated region body
PF: predicated region fallthrough
CT: control target
= control target key end

     0   :  { %7 = vsyncpa [#allocation5], 0  ;;  %s959_s0 = inlined_call_operand.hbm [shape: f32[2], index: 0, kind: input, shape index: {}]   ;;  %s960_s1 = inlined_call_operand.hbm [shape: f32[1024,128], index: 1, kind: input, shape index: {}]   ;;  %s961_s2 = inlined_call_operand.hbm [shape: f32[1024,128], index: 2, kind: output, shape index: {}]  }
   0x1   :  { %8 = vsyncpa [#allocation3], 0 }
   0x2   :  { %9 = vsyncpa [#allocation4], 0  ;;  %s577_s11 = scalar_lea.hbm %s959_s0, 16 }
   0x3   :  { %p578_p0 = scmp.ne.s32.totalorder %s959_s0, %s577_s11  ;;  %p581_p1 = scmp.lt.u32.totalorder %s577_s11, %s959_s0 }
   0x5   :  { %p583_p2 = pnand %p581_p1, %p578_p0 }
   0x7   :  { %586 = shalt.err (!%p583_p2)
}
   0x8   :  { %s637_s16 = smov [#allocation2]   ;;  %s638_s19 = smov [#allocation6]  }
   0x9   :  { %17 = dma.hbm_to_smem %s959_s0, 16, %s637_s16, [#allocation5]  }
   0xa   :  { %s23_s20 = sshll.u32 %s638_s19, 4  ;;  %s587_s23 = scalar_lea.hbm %s960_s1, 16384  ;;  %s24_s20 = int_to_ptr.vmem [resolvable:$true] %s23_s20 }
   0xb   :  { %p588_p3 = scmp.ne.s32.totalorder %s960_s1, %s587_s23  ;;  %p591_p4 = scmp.lt.u32.totalorder %s587_s23, %s960_s1 }
   0xd   :  { %p593_p5 = pnand %p591_p4, %p588_p3 }
   0xf   :  { %596 = shalt.err (!%p593_p5)
}
  0x10   :  { %s597_s28 = scalar_lea.vmem %s24_s20, 16384  ;;  %p602_p7 = scmp.lt.s32.totalorder %s24_s20, %s24_s20 }
  0x11   :  { %p598_p6 = scmp.ne.s32.totalorder %s24_s20, %s597_s28  ;;  %p603_p8 = scmp.lt.s32.totalorder %s597_s28, %s597_s28 }
  0x13   :  { %p604_p9 = por %p603_p8, %p602_p7 }
  0x15   :  { %p605_p10 = pnand %p604_p9, %p598_p6 }
  0x17   :  { %608 = shalt.err (!%p605_p10)
}
  0x18   :  { %s639_s0 = smov 128   ;;  %s640_s29 = smov 8  }
  0x19   :  { %29 = dma.hbm_to_vmem [thread:$0]  %s960_s1, 16384, %s24_s20, [#allocation3], %s639_s0, %s639_s0, %s640_s29  }
  0x1a   :  { %631 = dma.done.wait [#allocation5], 16  }
  0x1b   :  { %632 = vsyncadd [#allocation5], 4294967280 }
  0x1c   :  { %633 = dma.done.wait [#allocation3], 16384  }
  0x1d   :  { %634 = vsyncadd [#allocation3], 4294950912 }
  0x1e   :  { %36 = sfence }
  0x1f   :  { %s37_s4 = sld [smem:[#allocation2]]  ;;  %s571_s5 = sld [smem:[#allocation2 + $0x1]]  ;;  %v39_v0 = vld [vmem:[#allocation6] sm:$0xff]  ;;  %v40_v1 = vld [vmem:[#allocation6 + $0x8] sm:$0xff]  ;;  %v41_v2 = vld [vmem:[#allocation6 + $0x10] sm:$0xff] }
  0x20   :  { %v42_v3 = vld [vmem:[#allocation6 + $0x18] sm:$0xff]  ;;  %v43_v4 = vld [vmem:[#allocation6 + $0x20] sm:$0xff]  ;;  %v44_v5 = vld [vmem:[#allocation6 + $0x28] sm:$0xff]  ;;  %s641_s1 = smov [#allocation7]  }
  0x21   :  { %v45_v6 = vld [vmem:[#allocation6 + $0x30] sm:$0xff]  ;;  %v46_v7 = vld [vmem:[#allocation6 + $0x38] sm:$0xff]  ;;  %v47_v14 = vld [vmem:[#allocation6 + $0x40] sm:$0xff]  ;;  %s558_s6 = sshll.u32 %s641_s1, 4  ;;  %s559_s6 = int_to_ptr.vmem [resolvable:$true] %s558_s6 }
  0x22   :  { %v48_v15 = vld [vmem:[#allocation6 + $0x48] sm:$0xff]  ;;  %v49_v20 = vld [vmem:[#allocation6 + $0x50] sm:$0xff]  ;;  %v50_v21 = vld [vmem:[#allocation6 + $0x58] sm:$0xff]  ;;  %s609_s7 = scalar_lea.vmem %s559_s6, 16384  ;;  %p614_p12 = scmp.lt.s32.totalorder %s559_s6, %s559_s6 }
  0x23   :  { %v51_v22 = vld [vmem:[#allocation6 + $0x60] sm:$0xff]  ;;  %v52_v27 = vld [vmem:[#allocation6 + $0x68] sm:$0xff]  ;;  %v53_v28 = vld [vmem:[#allocation6 + $0x70] sm:$0xff]  ;;  %p610_p11 = scmp.ne.s32.totalorder %s559_s6, %s609_s7  ;;  %p615_p13 = scmp.lt.s32.totalorder %s609_s7, %s609_s7 }
  0x24   :  { %v54_v29 = vld [vmem:[#allocation6 + $0x78] sm:$0xff]  ;;  %v55_v38 = vld [vmem:[#allocation6 + $0x80] sm:$0xff]  ;;  %v56_v39 = vld [vmem:[#allocation6 + $0x88] sm:$0xff] }
  0x25   :  { %v684_v8 = vstv %s37_s4  ;;  %v686_v9 = vstv %s571_s5  ;;  %v57_v44 = vld [vmem:[#allocation6 + $0x90] sm:$0xff]  ;;  %v58_v45 = vld [vmem:[#allocation6 + $0x98] sm:$0xff]  ;;  %v59_v46 = vld [vmem:[#allocation6 + $0xa0] sm:$0xff]  ;;  %p616_p0 = por %p615_p13, %p614_p12 }
  0x26   :  { %v168_v10 = vmul.f32 %v684_v8, %v39_v0  ;;  %v169_v11 = vmul.f32 %v684_v8, %v40_v1  ;;  %v170_v12 = vmul.f32 %v684_v8, %v41_v2  ;;  %v171_v13 = vmul.f32 %v684_v8, %v42_v3  ;;  %v60_v51 = vld [vmem:[#allocation6 + $0xa8] sm:$0xff]  ;;  %v61_v52 = vld [vmem:[#allocation6 + $0xb0] sm:$0xff]  ;;  %v62_v53 = vld [vmem:[#allocation6 + $0xb8] sm:$0xff] }
  0x27   :  { %v172_v16 = vmul.f32 %v684_v8, %v43_v4  ;;  %v173_v17 = vmul.f32 %v684_v8, %v44_v5  ;;  %v174_v18 = vmul.f32 %v684_v8, %v45_v6  ;;  %v175_v19 = vmul.f32 %v684_v8, %v46_v7  ;;  %v63_v62 = vld [vmem:[#allocation6 + $0xc0] sm:$0xff]  ;;  %v64_v63 = vld [vmem:[#allocation6 + $0xc8] sm:$0xff]  ;;  %v65_v4 = vld [vmem:[#allocation6 + $0xd0] sm:$0xff]  ;;  %p617_p1 = pnand %p616_p0, %p610_p11 }
  0x28   :  { %v297_v23 = vadd.f32 %v686_v9, %v168_v10  ;;  %v298_v24 = vadd.f32 %v686_v9, %v169_v11  ;;  %v299_v25 = vadd.f32 %v686_v9, %v170_v12  ;;  %v300_v26 = vadd.f32 %v686_v9, %v171_v13  ;;  %v66_v5 = vld [vmem:[#allocation6 + $0xd8] sm:$0xff]  ;;  %v67_v6 = vld [vmem:[#allocation6 + $0xe0] sm:$0xff]  ;;  %v68_v13 = vld [vmem:[#allocation6 + $0xe8] sm:$0xff] }
  0x29   :  { %v301_v30 = vadd.f32 %v686_v9, %v172_v16  ;;  %v302_v31 = vadd.f32 %v686_v9, %v173_v17  ;;  %v303_v32 = vadd.f32 %v686_v9, %v174_v18  ;;  %v304_v33 = vadd.f32 %v686_v9, %v175_v19 }
  0x2a   :  { %425 = vst [vmem:[#allocation7] sm:$0xff] %v297_v23  ;;  %426 = vst [vmem:[#allocation7 + $0x8] sm:$0xff] %v298_v24  ;;  %v176_v34 = vmul.f32 %v684_v8, %v47_v14  ;;  %v177_v35 = vmul.f32 %v684_v8, %v48_v15  ;;  %v178_v36 = vmul.f32 %v684_v8, %v49_v20  ;;  %v69_v14 = vld [vmem:[#allocation6 + $0xf0] sm:$0xff]  ;;  %v70_v15 = vld [vmem:[#allocation6 + $0xf8] sm:$0xff] }
  0x2b   :  { %427 = vst [vmem:[#allocation7 + $0x10] sm:$0xff] %v299_v25  ;;  %428 = vst [vmem:[#allocation7 + $0x18] sm:$0xff] %v300_v26  ;;  %v179_v37 = vmul.f32 %v684_v8, %v50_v21  ;;  %v180_v40 = vmul.f32 %v684_v8, %v51_v22  ;;  %v181_v41 = vmul.f32 %v684_v8, %v52_v27  ;;  %v71_v24 = vld [vmem:[#allocation6 + $0x100] sm:$0xff]  ;;  %v72_v25 = vld [vmem:[#allocation6 + $0x108] sm:$0xff] }
  0x2c   :  { %429 = vst [vmem:[#allocation7 + $0x20] sm:$0xff] %v301_v30  ;;  %430 = vst [vmem:[#allocation7 + $0x28] sm:$0xff] %v302_v31  ;;  %v182_v42 = vmul.f32 %v684_v8, %v53_v28  ;;  %v183_v43 = vmul.f32 %v684_v8, %v54_v29  ;;  %v305_v47 = vadd.f32 %v686_v9, %v176_v34  ;;  %v73_v30 = vld [vmem:[#allocation6 + $0x110] sm:$0xff]  ;;  %v74_v31 = vld [vmem:[#allocation6 + $0x118] sm:$0xff] }
  0x2d   :  { %431 = vst [vmem:[#allocation7 + $0x30] sm:$0xff] %v303_v32  ;;  %432 = vst [vmem:[#allocation7 + $0x38] sm:$0xff] %v304_v33  ;;  %v306_v48 = vadd.f32 %v686_v9, %v177_v35  ;;  %v307_v49 = vadd.f32 %v686_v9, %v178_v36  ;;  %v308_v50 = vadd.f32 %v686_v9, %v179_v37  ;;  %v75_v32 = vld [vmem:[#allocation6 + $0x120] sm:$0xff]  ;;  %v76_v37 = vld [vmem:[#allocation6 + $0x128] sm:$0xff] }
  0x2e   :  { %v309_v54 = vadd.f32 %v686_v9, %v180_v40  ;;  %v310_v55 = vadd.f32 %v686_v9, %v181_v41  ;;  %v311_v56 = vadd.f32 %v686_v9, %v182_v42  ;;  %v312_v57 = vadd.f32 %v686_v9, %v183_v43  ;;  %433 = vst [vmem:[#allocation7 + $0x40] sm:$0xff] %v305_v47 }
  0x2f   :  { %434 = vst [vmem:[#allocation7 + $0x48] sm:$0xff] %v306_v48  ;;  %435 = vst [vmem:[#allocation7 + $0x50] sm:$0xff] %v307_v49  ;;  %v184_v58 = vmul.f32 %v684_v8, %v55_v38  ;;  %v185_v59 = vmul.f32 %v684_v8, %v56_v39  ;;  %v186_v60 = vmul.f32 %v684_v8, %v57_v44  ;;  %v77_v38 = vld [vmem:[#allocation6 + $0x130] sm:$0xff]  ;;  %v78_v39 = vld [vmem:[#allocation6 + $0x138] sm:$0xff] }
  0x30   :  { %436 = vst [vmem:[#allocation7 + $0x58] sm:$0xff] %v308_v50  ;;  %v187_v61 = vmul.f32 %v684_v8, %v58_v45  ;;  %437 = vst [vmem:[#allocation7 + $0x60] sm:$0xff] %v309_v54  ;;  %v188_v0 = vmul.f32 %v684_v8, %v59_v46  ;;  %v189_v1 = vmul.f32 %v684_v8, %v60_v51  ;;  %v79_v48 = vld [vmem:[#allocation6 + $0x140] sm:$0xff]  ;;  %v80_v49 = vld [vmem:[#allocation6 + $0x148] sm:$0xff] }
  0x31   :  { %438 = vst [vmem:[#allocation7 + $0x68] sm:$0xff] %v310_v55  ;;  %439 = vst [vmem:[#allocation7 + $0x70] sm:$0xff] %v311_v56  ;;  %v190_v2 = vmul.f32 %v684_v8, %v61_v52  ;;  %v191_v3 = vmul.f32 %v684_v8, %v62_v53  ;;  %v313_v7 = vadd.f32 %v686_v9, %v184_v58  ;;  %v81_v54 = vld [vmem:[#allocation6 + $0x150] sm:$0xff]  ;;  %v82_v55 = vld [vmem:[#allocation6 + $0x158] sm:$0xff] }
  0x32   :  { %440 = vst [vmem:[#allocation7 + $0x78] sm:$0xff] %v312_v57  ;;  %v314_v10 = vadd.f32 %v686_v9, %v185_v59  ;;  %v315_v11 = vadd.f32 %v686_v9, %v186_v60  ;;  %v316_v12 = vadd.f32 %v686_v9, %v187_v61  ;;  %v317_v16 = vadd.f32 %v686_v9, %v188_v0  ;;  %v83_v56 = vld [vmem:[#allocation6 + $0x160] sm:$0xff]  ;;  %v84_v61 = vld [vmem:[#allocation6 + $0x168] sm:$0xff] }
  0x33   :  { %v318_v17 = vadd.f32 %v686_v9, %v189_v1  ;;  %v319_v18 = vadd.f32 %v686_v9, %v190_v2  ;;  %v320_v19 = vadd.f32 %v686_v9, %v191_v3  ;;  %441 = vst [vmem:[#allocation7 + $0x80] sm:$0xff] %v313_v7  ;;  %v192_v20 = vmul.f32 %v684_v8, %v63_v62  ;;  %v85_v62 = vld [vmem:[#allocation6 + $0x170] sm:$0xff] }
  0x34   :  { %442 = vst [vmem:[#allocation7 + $0x88] sm:$0xff] %v314_v10  ;;  %443 = vst [vmem:[#allocation7 + $0x90] sm:$0xff] %v315_v11  ;;  %v193_v21 = vmul.f32 %v684_v8, %v64_v63  ;;  %v194_v22 = vmul.f32 %v684_v8, %v65_v4  ;;  %v195_v23 = vmul.f32 %v684_v8, %v66_v5  ;;  %v86_v63 = vld [vmem:[#allocation6 + $0x178] sm:$0xff]  ;;  %v87_v10 = vld [vmem:[#allocation6 + $0x180] sm:$0xff] }
  0x35   :  { %444 = vst [vmem:[#allocation7 + $0x98] sm:$0xff] %v316_v12  ;;  %445 = vst [vmem:[#allocation7 + $0xa0] sm:$0xff] %v317_v16  ;;  %v196_v26 = vmul.f32 %v684_v8, %v67_v6  ;;  %v197_v27 = vmul.f32 %v684_v8, %v68_v13  ;;  %v198_v28 = vmul.f32 %v684_v8, %v69_v14  ;;  %v88_v11 = vld [vmem:[#allocation6 + $0x188] sm:$0xff]  ;;  %v89_v16 = vld [vmem:[#allocation6 + $0x190] sm:$0xff] }
  0x36   :  { %446 = vst [vmem:[#allocation7 + $0xa8] sm:$0xff] %v318_v17  ;;  %447 = vst [vmem:[#allocation7 + $0xb0] sm:$0xff] %v319_v18  ;;  %v199_v29 = vmul.f32 %v684_v8, %v70_v15  ;;  %v321_v33 = vadd.f32 %v686_v9, %v192_v20  ;;  %v322_v34 = vadd.f32 %v686_v9, %v193_v21  ;;  %v90_v17 = vld [vmem:[#allocation6 + $0x198] sm:$0xff]  ;;  %v91_v18 = vld [vmem:[#allocation6 + $0x1a0] sm:$0xff] }
  0x37   :  { %448 = vst [vmem:[#allocation7 + $0xb8] sm:$0xff] %v320_v19  ;;  %v323_v35 = vadd.f32 %v686_v9, %v194_v22  ;;  %v324_v36 = vadd.f32 %v686_v9, %v195_v23  ;;  %v325_v40 = vadd.f32 %v686_v9, %v196_v26  ;;  %v326_v41 = vadd.f32 %v686_v9, %v197_v27  ;;  %v92_v23 = vld [vmem:[#allocation6 + $0x1a8] sm:$0xff] }
  0x38   :  { %v327_v42 = vadd.f32 %v686_v9, %v198_v28  ;;  %v328_v43 = vadd.f32 %v686_v9, %v199_v29  ;;  %449 = vst [vmem:[#allocation7 + $0xc0] sm:$0xff] %v321_v33  ;;  %450 = vst [vmem:[#allocation7 + $0xc8] sm:$0xff] %v322_v34  ;;  %v200_v44 = vmul.f32 %v684_v8, %v71_v24  ;;  %v93_v24 = vld [vmem:[#allocation6 + $0x1b0] sm:$0xff]  ;;  %v95_v34 = vld [vmem:[#allocation6 + $0x1c0] sm:$0xff] }
  0x39   :  { %451 = vst [vmem:[#allocation7 + $0xd0] sm:$0xff] %v323_v35  ;;  %452 = vst [vmem:[#allocation7 + $0xd8] sm:$0xff] %v324_v36  ;;  %v201_v45 = vmul.f32 %v684_v8, %v72_v25  ;;  %v202_v46 = vmul.f32 %v684_v8, %v73_v30  ;;  %v203_v47 = vmul.f32 %v684_v8, %v74_v31  ;;  %v94_v25 = vld [vmem:[#allocation6 + $0x1b8] sm:$0xff]  ;;  %v96_v35 = vld [vmem:[#allocation6 + $0x1c8] sm:$0xff] }
  0x3a   :  { %453 = vst [vmem:[#allocation7 + $0xe0] sm:$0xff] %v325_v40  ;;  %454 = vst [vmem:[#allocation7 + $0xe8] sm:$0xff] %v326_v41  ;;  %v204_v50 = vmul.f32 %v684_v8, %v75_v32  ;;  %v205_v51 = vmul.f32 %v684_v8, %v76_v37  ;;  %v206_v52 = vmul.f32 %v684_v8, %v77_v38  ;;  %v97_v40 = vld [vmem:[#allocation6 + $0x1d0] sm:$0xff]  ;;  %v98_v41 = vld [vmem:[#allocation6 + $0x1d8] sm:$0xff] }
  0x3b   :  { %455 = vst [vmem:[#allocation7 + $0xf0] sm:$0xff] %v327_v42  ;;  %456 = vst [vmem:[#allocation7 + $0xf8] sm:$0xff] %v328_v43  ;;  %v207_v53 = vmul.f32 %v684_v8, %v78_v39  ;;  %v329_v57 = vadd.f32 %v686_v9, %v200_v44  ;;  %v330_v58 = vadd.f32 %v686_v9, %v201_v45  ;;  %v99_v42 = vld [vmem:[#allocation6 + $0x1e0] sm:$0xff] }
  0x3c   :  { %v331_v59 = vadd.f32 %v686_v9, %v202_v46  ;;  %v332_v60 = vadd.f32 %v686_v9, %v203_v47  ;;  %v333_v0 = vadd.f32 %v686_v9, %v204_v50  ;;  %v334_v1 = vadd.f32 %v686_v9, %v205_v51  ;;  %v100_v47 = vld [vmem:[#allocation6 + $0x1e8] sm:$0xff] }
  0x3d   :  { %v335_v2 = vadd.f32 %v686_v9, %v206_v52  ;;  %v336_v3 = vadd.f32 %v686_v9, %v207_v53  ;;  %457 = vst [vmem:[#allocation7 + $0x100] sm:$0xff] %v329_v57  ;;  %458 = vst [vmem:[#allocation7 + $0x108] sm:$0xff] %v330_v58  ;;  %v208_v4 = vmul.f32 %v684_v8, %v79_v48  ;;  %v101_v48 = vld [vmem:[#allocation6 + $0x1f0] sm:$0xff]  ;;  %v103_v58 = vld [vmem:[#allocation6 + $0x200] sm:$0xff] }
  0x3e   :  { %459 = vst [vmem:[#allocation7 + $0x110] sm:$0xff] %v331_v59  ;;  %460 = vst [vmem:[#allocation7 + $0x118] sm:$0xff] %v332_v60  ;;  %v209_v5 = vmul.f32 %v684_v8, %v80_v49  ;;  %v210_v6 = vmul.f32 %v684_v8, %v81_v54  ;;  %v211_v7 = vmul.f32 %v684_v8, %v82_v55  ;;  %v102_v49 = vld [vmem:[#allocation6 + $0x1f8] sm:$0xff]  ;;  %v104_v59 = vld [vmem:[#allocation6 + $0x208] sm:$0xff] }
  0x3f   :  { %461 = vst [vmem:[#allocation7 + $0x120] sm:$0xff] %v333_v0  ;;  %462 = vst [vmem:[#allocation7 + $0x128] sm:$0xff] %v334_v1  ;;  %v212_v12 = vmul.f32 %v684_v8, %v83_v56  ;;  %v213_v13 = vmul.f32 %v684_v8, %v84_v61  ;;  %v214_v14 = vmul.f32 %v684_v8, %v85_v62  ;;  %v105_v0 = vld [vmem:[#allocation6 + $0x210] sm:$0xff]  ;;  %v106_v1 = vld [vmem:[#allocation6 + $0x218] sm:$0xff] }
  0x40   :  { %463 = vst [vmem:[#allocation7 + $0x130] sm:$0xff] %v335_v2  ;;  %464 = vst [vmem:[#allocation7 + $0x138] sm:$0xff] %v336_v3  ;;  %v215_v15 = vmul.f32 %v684_v8, %v86_v63  ;;  %v337_v19 = vadd.f32 %v686_v9, %v208_v4  ;;  %v338_v20 = vadd.f32 %v686_v9, %v209_v5  ;;  %v107_v2 = vld [vmem:[#allocation6 + $0x220] sm:$0xff] }
  0x41   :  { %v339_v21 = vadd.f32 %v686_v9, %v210_v6  ;;  %v340_v22 = vadd.f32 %v686_v9, %v211_v7  ;;  %v341_v26 = vadd.f32 %v686_v9, %v212_v12  ;;  %v342_v27 = vadd.f32 %v686_v9, %v213_v13  ;;  %v108_v7 = vld [vmem:[#allocation6 + $0x228] sm:$0xff] }
  0x42   :  { %v343_v28 = vadd.f32 %v686_v9, %v214_v14  ;;  %v344_v29 = vadd.f32 %v686_v9, %v215_v15  ;;  %465 = vst [vmem:[#allocation7 + $0x140] sm:$0xff] %v337_v19  ;;  %466 = vst [vmem:[#allocation7 + $0x148] sm:$0xff] %v338_v20  ;;  %v216_v30 = vmul.f32 %v684_v8, %v87_v10  ;;  %v109_v10 = vld [vmem:[#allocation6 + $0x230] sm:$0xff]  ;;  %v111_v20 = vld [vmem:[#allocation6 + $0x240] sm:$0xff] }
  0x43   :  { %467 = vst [vmem:[#allocation7 + $0x150] sm:$0xff] %v339_v21  ;;  %468 = vst [vmem:[#allocation7 + $0x158] sm:$0xff] %v340_v22  ;;  %v217_v31 = vmul.f32 %v684_v8, %v88_v11  ;;  %v218_v32 = vmul.f32 %v684_v8, %v89_v16  ;;  %v219_v33 = vmul.f32 %v684_v8, %v90_v17  ;;  %v110_v11 = vld [vmem:[#allocation6 + $0x238] sm:$0xff]  ;;  %v112_v21 = vld [vmem:[#allocation6 + $0x248] sm:$0xff] }
  0x44   :  { %469 = vst [vmem:[#allocation7 + $0x160] sm:$0xff] %v341_v26  ;;  %470 = vst [vmem:[#allocation7 + $0x168] sm:$0xff] %v342_v27  ;;  %v220_v36 = vmul.f32 %v684_v8, %v91_v18  ;;  %v221_v37 = vmul.f32 %v684_v8, %v92_v23  ;;  %v222_v38 = vmul.f32 %v684_v8, %v93_v24  ;;  %v113_v26 = vld [vmem:[#allocation6 + $0x250] sm:$0xff]  ;;  %v114_v27 = vld [vmem:[#allocation6 + $0x258] sm:$0xff] }
  0x45   :  { %471 = vst [vmem:[#allocation7 + $0x170] sm:$0xff] %v343_v28  ;;  %472 = vst [vmem:[#allocation7 + $0x178] sm:$0xff] %v344_v29  ;;  %v223_v39 = vmul.f32 %v684_v8, %v94_v25  ;;  %v345_v43 = vadd.f32 %v686_v9, %v216_v30  ;;  %v346_v44 = vadd.f32 %v686_v9, %v217_v31  ;;  %v115_v28 = vld [vmem:[#allocation6 + $0x260] sm:$0xff] }
  0x46   :  { %v347_v45 = vadd.f32 %v686_v9, %v218_v32  ;;  %v348_v46 = vadd.f32 %v686_v9, %v219_v33  ;;  %v349_v50 = vadd.f32 %v686_v9, %v220_v36  ;;  %v350_v51 = vadd.f32 %v686_v9, %v221_v37  ;;  %v116_v33 = vld [vmem:[#allocation6 + $0x268] sm:$0xff] }
  0x47   :  { %v351_v52 = vadd.f32 %v686_v9, %v222_v38  ;;  %v352_v53 = vadd.f32 %v686_v9, %v223_v39  ;;  %473 = vst [vmem:[#allocation7 + $0x180] sm:$0xff] %v345_v43  ;;  %474 = vst [vmem:[#allocation7 + $0x188] sm:$0xff] %v346_v44  ;;  %v224_v54 = vmul.f32 %v684_v8, %v95_v34  ;;  %v117_v34 = vld [vmem:[#allocation6 + $0x270] sm:$0xff]  ;;  %v119_v44 = vld [vmem:[#allocation6 + $0x280] sm:$0xff] }
  0x48   :  { %475 = vst [vmem:[#allocation7 + $0x190] sm:$0xff] %v347_v45  ;;  %476 = vst [vmem:[#allocation7 + $0x198] sm:$0xff] %v348_v46  ;;  %v225_v55 = vmul.f32 %v684_v8, %v96_v35  ;;  %v226_v56 = vmul.f32 %v684_v8, %v97_v40  ;;  %v227_v57 = vmul.f32 %v684_v8, %v98_v41  ;;  %v118_v35 = vld [vmem:[#allocation6 + $0x278] sm:$0xff]  ;;  %v120_v45 = vld [vmem:[#allocation6 + $0x288] sm:$0xff] }
  0x49   :  { %477 = vst [vmem:[#allocation7 + $0x1a0] sm:$0xff] %v349_v50  ;;  %478 = vst [vmem:[#allocation7 + $0x1a8] sm:$0xff] %v350_v51  ;;  %v228_v60 = vmul.f32 %v684_v8, %v99_v42  ;;  %v229_v61 = vmul.f32 %v684_v8, %v100_v47  ;;  %v230_v62 = vmul.f32 %v684_v8, %v101_v48  ;;  %v121_v50 = vld [vmem:[#allocation6 + $0x290] sm:$0xff]  ;;  %v122_v51 = vld [vmem:[#allocation6 + $0x298] sm:$0xff] }
  0x4a   :  { %479 = vst [vmem:[#allocation7 + $0x1b0] sm:$0xff] %v351_v52  ;;  %480 = vst [vmem:[#allocation7 + $0x1b8] sm:$0xff] %v352_v53  ;;  %v231_v63 = vmul.f32 %v684_v8, %v102_v49  ;;  %v353_v3 = vadd.f32 %v686_v9, %v224_v54  ;;  %v354_v4 = vadd.f32 %v686_v9, %v225_v55  ;;  %v123_v52 = vld [vmem:[#allocation6 + $0x2a0] sm:$0xff] }
  0x4b   :  { %v355_v5 = vadd.f32 %v686_v9, %v226_v56  ;;  %v356_v6 = vadd.f32 %v686_v9, %v227_v57  ;;  %v357_v12 = vadd.f32 %v686_v9, %v228_v60  ;;  %v358_v13 = vadd.f32 %v686_v9, %v229_v61  ;;  %v124_v57 = vld [vmem:[#allocation6 + $0x2a8] sm:$0xff] }
  0x4c   :  { %v359_v14 = vadd.f32 %v686_v9, %v230_v62  ;;  %v360_v15 = vadd.f32 %v686_v9, %v231_v63  ;;  %481 = vst [vmem:[#allocation7 + $0x1c0] sm:$0xff] %v353_v3  ;;  %482 = vst [vmem:[#allocation7 + $0x1c8] sm:$0xff] %v354_v4  ;;  %v232_v16 = vmul.f32 %v684_v8, %v103_v58  ;;  %v125_v58 = vld [vmem:[#allocation6 + $0x2b0] sm:$0xff]  ;;  %v127_v4 = vld [vmem:[#allocation6 + $0x2c0] sm:$0xff] }
  0x4d   :  { %483 = vst [vmem:[#allocation7 + $0x1d0] sm:$0xff] %v355_v5  ;;  %484 = vst [vmem:[#allocation7 + $0x1d8] sm:$0xff] %v356_v6  ;;  %v233_v17 = vmul.f32 %v684_v8, %v104_v59  ;;  %v234_v18 = vmul.f32 %v684_v8, %v105_v0  ;;  %v235_v19 = vmul.f32 %v684_v8, %v106_v1  ;;  %v126_v59 = vld [vmem:[#allocation6 + $0x2b8] sm:$0xff]  ;;  %v128_v5 = vld [vmem:[#allocation6 + $0x2c8] sm:$0xff] }
  0x4e   :  { %485 = vst [vmem:[#allocation7 + $0x1e0] sm:$0xff] %v357_v12  ;;  %486 = vst [vmem:[#allocation7 + $0x1e8] sm:$0xff] %v358_v13  ;;  %v236_v22 = vmul.f32 %v684_v8, %v107_v2  ;;  %v237_v23 = vmul.f32 %v684_v8, %v108_v7  ;;  %v238_v24 = vmul.f32 %v684_v8, %v109_v10  ;;  %v129_v12 = vld [vmem:[#allocation6 + $0x2d0] sm:$0xff]  ;;  %v130_v13 = vld [vmem:[#allocation6 + $0x2d8] sm:$0xff] }
  0x4f   :  { %487 = vst [vmem:[#allocation7 + $0x1f0] sm:$0xff] %v359_v14  ;;  %488 = vst [vmem:[#allocation7 + $0x1f8] sm:$0xff] %v360_v15  ;;  %v239_v25 = vmul.f32 %v684_v8, %v110_v11  ;;  %v361_v29 = vadd.f32 %v686_v9, %v232_v16  ;;  %v362_v30 = vadd.f32 %v686_v9, %v233_v17  ;;  %v131_v14 = vld [vmem:[#allocation6 + $0x2e0] sm:$0xff] }
  0x50   :  { %v363_v31 = vadd.f32 %v686_v9, %v234_v18  ;;  %v364_v32 = vadd.f32 %v686_v9, %v235_v19  ;;  %v365_v36 = vadd.f32 %v686_v9, %v236_v22  ;;  %v366_v37 = vadd.f32 %v686_v9, %v237_v23  ;;  %v132_v19 = vld [vmem:[#allocation6 + $0x2e8] sm:$0xff] }
  0x51   :  { %v367_v38 = vadd.f32 %v686_v9, %v238_v24  ;;  %v368_v39 = vadd.f32 %v686_v9, %v239_v25  ;;  %489 = vst [vmem:[#allocation7 + $0x200] sm:$0xff] %v361_v29  ;;  %490 = vst [vmem:[#allocation7 + $0x208] sm:$0xff] %v362_v30  ;;  %v240_v40 = vmul.f32 %v684_v8, %v111_v20  ;;  %v133_v20 = vld [vmem:[#allocation6 + $0x2f0] sm:$0xff]  ;;  %v135_v30 = vld [vmem:[#allocation6 + $0x300] sm:$0xff] }
  0x52   :  { %491 = vst [vmem:[#allocation7 + $0x210] sm:$0xff] %v363_v31  ;;  %492 = vst [vmem:[#allocation7 + $0x218] sm:$0xff] %v364_v32  ;;  %v241_v41 = vmul.f32 %v684_v8, %v112_v21  ;;  %v242_v42 = vmul.f32 %v684_v8, %v113_v26  ;;  %v243_v43 = vmul.f32 %v684_v8, %v114_v27  ;;  %v134_v21 = vld [vmem:[#allocation6 + $0x2f8] sm:$0xff]  ;;  %v136_v31 = vld [vmem:[#allocation6 + $0x308] sm:$0xff] }
  0x53   :  { %493 = vst [vmem:[#allocation7 + $0x220] sm:$0xff] %v365_v36  ;;  %494 = vst [vmem:[#allocation7 + $0x228] sm:$0xff] %v366_v37  ;;  %v244_v46 = vmul.f32 %v684_v8, %v115_v28  ;;  %v245_v47 = vmul.f32 %v684_v8, %v116_v33  ;;  %v246_v48 = vmul.f32 %v684_v8, %v117_v34  ;;  %v137_v36 = vld [vmem:[#allocation6 + $0x310] sm:$0xff]  ;;  %v138_v37 = vld [vmem:[#allocation6 + $0x318] sm:$0xff] }
  0x54   :  { %495 = vst [vmem:[#allocation7 + $0x230] sm:$0xff] %v367_v38  ;;  %496 = vst [vmem:[#allocation7 + $0x238] sm:$0xff] %v368_v39  ;;  %v247_v49 = vmul.f32 %v684_v8, %v118_v35  ;;  %v369_v53 = vadd.f32 %v686_v9, %v240_v40  ;;  %v370_v54 = vadd.f32 %v686_v9, %v241_v41  ;;  %v139_v38 = vld [vmem:[#allocation6 + $0x320] sm:$0xff] }
  0x55   :  { %v371_v55 = vadd.f32 %v686_v9, %v242_v42  ;;  %v372_v56 = vadd.f32 %v686_v9, %v243_v43  ;;  %v373_v60 = vadd.f32 %v686_v9, %v244_v46  ;;  %v374_v61 = vadd.f32 %v686_v9, %v245_v47  ;;  %v140_v43 = vld [vmem:[#allocation6 + $0x328] sm:$0xff] }
  0x56   :  { %v375_v62 = vadd.f32 %v686_v9, %v246_v48  ;;  %v376_v63 = vadd.f32 %v686_v9, %v247_v49  ;;  %497 = vst [vmem:[#allocation7 + $0x240] sm:$0xff] %v369_v53  ;;  %498 = vst [vmem:[#allocation7 + $0x248] sm:$0xff] %v370_v54  ;;  %v248_v0 = vmul.f32 %v684_v8, %v119_v44  ;;  %v141_v44 = vld [vmem:[#allocation6 + $0x330] sm:$0xff]  ;;  %v143_v54 = vld [vmem:[#allocation6 + $0x340] sm:$0xff] }
  0x57   :  { %499 = vst [vmem:[#allocation7 + $0x250] sm:$0xff] %v371_v55  ;;  %500 = vst [vmem:[#allocation7 + $0x258] sm:$0xff] %v372_v56  ;;  %v249_v1 = vmul.f32 %v684_v8, %v120_v45  ;;  %v250_v2 = vmul.f32 %v684_v8, %v121_v50  ;;  %v251_v3 = vmul.f32 %v684_v8, %v122_v51  ;;  %v142_v45 = vld [vmem:[#allocation6 + $0x338] sm:$0xff]  ;;  %v144_v55 = vld [vmem:[#allocation6 + $0x348] sm:$0xff] }
  0x58   :  { %501 = vst [vmem:[#allocation7 + $0x260] sm:$0xff] %v373_v60  ;;  %502 = vst [vmem:[#allocation7 + $0x268] sm:$0xff] %v374_v61  ;;  %v252_v6 = vmul.f32 %v684_v8, %v123_v52  ;;  %v253_v7 = vmul.f32 %v684_v8, %v124_v57  ;;  %v254_v10 = vmul.f32 %v684_v8, %v125_v58  ;;  %v145_v60 = vld [vmem:[#allocation6 + $0x350] sm:$0xff]  ;;  %v146_v61 = vld [vmem:[#allocation6 + $0x358] sm:$0xff] }
  0x59   :  { %503 = vst [vmem:[#allocation7 + $0x270] sm:$0xff] %v375_v62  ;;  %504 = vst [vmem:[#allocation7 + $0x278] sm:$0xff] %v376_v63  ;;  %v255_v11 = vmul.f32 %v684_v8, %v126_v59  ;;  %v377_v15 = vadd.f32 %v686_v9, %v248_v0  ;;  %v378_v16 = vadd.f32 %v686_v9, %v249_v1  ;;  %v147_v62 = vld [vmem:[#allocation6 + $0x360] sm:$0xff] }
  0x5a   :  { %v379_v17 = vadd.f32 %v686_v9, %v250_v2  ;;  %v380_v18 = vadd.f32 %v686_v9, %v251_v3  ;;  %v381_v22 = vadd.f32 %v686_v9, %v252_v6  ;;  %v382_v23 = vadd.f32 %v686_v9, %v253_v7  ;;  %v148_v3 = vld [vmem:[#allocation6 + $0x368] sm:$0xff] }
  0x5b   :  { %v383_v24 = vadd.f32 %v686_v9, %v254_v10  ;;  %v384_v25 = vadd.f32 %v686_v9, %v255_v11  ;;  %505 = vst [vmem:[#allocation7 + $0x280] sm:$0xff] %v377_v15  ;;  %506 = vst [vmem:[#allocation7 + $0x288] sm:$0xff] %v378_v16  ;;  %v256_v26 = vmul.f32 %v684_v8, %v127_v4  ;;  %v149_v4 = vld [vmem:[#allocation6 + $0x370] sm:$0xff]  ;;  %v151_v16 = vld [vmem:[#allocation6 + $0x380] sm:$0xff] }
  0x5c   :  { %507 = vst [vmem:[#allocation7 + $0x290] sm:$0xff] %v379_v17  ;;  %508 = vst [vmem:[#allocation7 + $0x298] sm:$0xff] %v380_v18  ;;  %v257_v27 = vmul.f32 %v684_v8, %v128_v5  ;;  %v258_v28 = vmul.f32 %v684_v8, %v129_v12  ;;  %v259_v29 = vmul.f32 %v684_v8, %v130_v13  ;;  %v150_v5 = vld [vmem:[#allocation6 + $0x378] sm:$0xff]  ;;  %v152_v17 = vld [vmem:[#allocation6 + $0x388] sm:$0xff] }
  0x5d   :  { %509 = vst [vmem:[#allocation7 + $0x2a0] sm:$0xff] %v381_v22  ;;  %510 = vst [vmem:[#allocation7 + $0x2a8] sm:$0xff] %v382_v23  ;;  %v260_v32 = vmul.f32 %v684_v8, %v131_v14  ;;  %v261_v33 = vmul.f32 %v684_v8, %v132_v19  ;;  %v262_v34 = vmul.f32 %v684_v8, %v133_v20  ;;  %v153_v22 = vld [vmem:[#allocation6 + $0x390] sm:$0xff]  ;;  %v154_v23 = vld [vmem:[#allocation6 + $0x398] sm:$0xff] }
  0x5e   :  { %511 = vst [vmem:[#allocation7 + $0x2b0] sm:$0xff] %v383_v24  ;;  %512 = vst [vmem:[#allocation7 + $0x2b8] sm:$0xff] %v384_v25  ;;  %v263_v35 = vmul.f32 %v684_v8, %v134_v21  ;;  %v385_v39 = vadd.f32 %v686_v9, %v256_v26  ;;  %v386_v40 = vadd.f32 %v686_v9, %v257_v27  ;;  %v155_v24 = vld [vmem:[#allocation6 + $0x3a0] sm:$0xff] }
  0x5f   :  { %v387_v41 = vadd.f32 %v686_v9, %v258_v28  ;;  %v388_v42 = vadd.f32 %v686_v9, %v259_v29  ;;  %v389_v46 = vadd.f32 %v686_v9, %v260_v32  ;;  %v390_v47 = vadd.f32 %v686_v9, %v261_v33  ;;  %v156_v29 = vld [vmem:[#allocation6 + $0x3a8] sm:$0xff] }
  0x60   :  { %v391_v48 = vadd.f32 %v686_v9, %v262_v34  ;;  %v392_v49 = vadd.f32 %v686_v9, %v263_v35  ;;  %513 = vst [vmem:[#allocation7 + $0x2c0] sm:$0xff] %v385_v39  ;;  %514 = vst [vmem:[#allocation7 + $0x2c8] sm:$0xff] %v386_v40  ;;  %v264_v50 = vmul.f32 %v684_v8, %v135_v30  ;;  %v157_v30 = vld [vmem:[#allocation6 + $0x3b0] sm:$0xff]  ;;  %v159_v40 = vld [vmem:[#allocation6 + $0x3c0] sm:$0xff] }
  0x61   :  { %515 = vst [vmem:[#allocation7 + $0x2d0] sm:$0xff] %v387_v41  ;;  %516 = vst [vmem:[#allocation7 + $0x2d8] sm:$0xff] %v388_v42  ;;  %v265_v51 = vmul.f32 %v684_v8, %v136_v31  ;;  %v266_v52 = vmul.f32 %v684_v8, %v137_v36  ;;  %v267_v53 = vmul.f32 %v684_v8, %v138_v37  ;;  %v158_v31 = vld [vmem:[#allocation6 + $0x3b8] sm:$0xff]  ;;  %v160_v41 = vld [vmem:[#allocation6 + $0x3c8] sm:$0xff] }
  0x62   :  { %517 = vst [vmem:[#allocation7 + $0x2e0] sm:$0xff] %v389_v46  ;;  %518 = vst [vmem:[#allocation7 + $0x2e8] sm:$0xff] %v390_v47  ;;  %v268_v56 = vmul.f32 %v684_v8, %v139_v38  ;;  %v269_v57 = vmul.f32 %v684_v8, %v140_v43  ;;  %v270_v58 = vmul.f32 %v684_v8, %v141_v44  ;;  %v161_v46 = vld [vmem:[#allocation6 + $0x3d0] sm:$0xff]  ;;  %v162_v47 = vld [vmem:[#allocation6 + $0x3d8] sm:$0xff] }
  0x63   :  { %519 = vst [vmem:[#allocation7 + $0x2f0] sm:$0xff] %v391_v48  ;;  %520 = vst [vmem:[#allocation7 + $0x2f8] sm:$0xff] %v392_v49  ;;  %v271_v59 = vmul.f32 %v684_v8, %v142_v45  ;;  %v393_v63 = vadd.f32 %v686_v9, %v264_v50  ;;  %v394_v0 = vadd.f32 %v686_v9, %v265_v51  ;;  %v163_v48 = vld [vmem:[#allocation6 + $0x3e0] sm:$0xff] }
  0x64   :  { %v395_v1 = vadd.f32 %v686_v9, %v266_v52  ;;  %v396_v2 = vadd.f32 %v686_v9, %v267_v53  ;;  %v397_v6 = vadd.f32 %v686_v9, %v268_v56  ;;  %v398_v7 = vadd.f32 %v686_v9, %v269_v57  ;;  %v164_v53 = vld [vmem:[#allocation6 + $0x3e8] sm:$0xff] }
  0x65   :  { %v399_v10 = vadd.f32 %v686_v9, %v270_v58  ;;  %v400_v11 = vadd.f32 %v686_v9, %v271_v59  ;;  %521 = vst [vmem:[#allocation7 + $0x300] sm:$0xff] %v393_v63  ;;  %522 = vst [vmem:[#allocation7 + $0x308] sm:$0xff] %v394_v0  ;;  %v272_v12 = vmul.f32 %v684_v8, %v143_v54  ;;  %v165_v54 = vld [vmem:[#allocation6 + $0x3f0] sm:$0xff] }
  0x66   :  { %523 = vst [vmem:[#allocation7 + $0x310] sm:$0xff] %v395_v1  ;;  %524 = vst [vmem:[#allocation7 + $0x318] sm:$0xff] %v396_v2  ;;  %v273_v13 = vmul.f32 %v684_v8, %v144_v55  ;;  %v274_v14 = vmul.f32 %v684_v8, %v145_v60  ;;  %v275_v15 = vmul.f32 %v684_v8, %v146_v61  ;;  %v166_v55 = vld [vmem:[#allocation6 + $0x3f8] sm:$0xff] }
  0x67   :  { %525 = vst [vmem:[#allocation7 + $0x320] sm:$0xff] %v397_v6  ;;  %526 = vst [vmem:[#allocation7 + $0x328] sm:$0xff] %v398_v7  ;;  %v276_v18 = vmul.f32 %v684_v8, %v147_v62  ;;  %v277_v19 = vmul.f32 %v684_v8, %v148_v3  ;;  %v278_v20 = vmul.f32 %v684_v8, %v149_v4 }
  0x68   :  { %527 = vst [vmem:[#allocation7 + $0x330] sm:$0xff] %v399_v10  ;;  %528 = vst [vmem:[#allocation7 + $0x338] sm:$0xff] %v400_v11  ;;  %v279_v21 = vmul.f32 %v684_v8, %v150_v5  ;;  %v401_v25 = vadd.f32 %v686_v9, %v272_v12  ;;  %v402_v26 = vadd.f32 %v686_v9, %v273_v13 }
  0x69   :  { %v403_v27 = vadd.f32 %v686_v9, %v274_v14  ;;  %v404_v28 = vadd.f32 %v686_v9, %v275_v15  ;;  %v405_v32 = vadd.f32 %v686_v9, %v276_v18  ;;  %v406_v33 = vadd.f32 %v686_v9, %v277_v19 }
  0x6a   :  { %v407_v34 = vadd.f32 %v686_v9, %v278_v20  ;;  %v408_v35 = vadd.f32 %v686_v9, %v279_v21  ;;  %529 = vst [vmem:[#allocation7 + $0x340] sm:$0xff] %v401_v25  ;;  %530 = vst [vmem:[#allocation7 + $0x348] sm:$0xff] %v402_v26  ;;  %v280_v36 = vmul.f32 %v684_v8, %v151_v16 }
  0x6b   :  { %531 = vst [vmem:[#allocation7 + $0x350] sm:$0xff] %v403_v27  ;;  %532 = vst [vmem:[#allocation7 + $0x358] sm:$0xff] %v404_v28  ;;  %v281_v37 = vmul.f32 %v684_v8, %v152_v17  ;;  %v282_v38 = vmul.f32 %v684_v8, %v153_v22  ;;  %v283_v39 = vmul.f32 %v684_v8, %v154_v23 }
  0x6c   :  { %533 = vst [vmem:[#allocation7 + $0x360] sm:$0xff] %v405_v32  ;;  %534 = vst [vmem:[#allocation7 + $0x368] sm:$0xff] %v406_v33  ;;  %v284_v42 = vmul.f32 %v684_v8, %v155_v24  ;;  %v285_v43 = vmul.f32 %v684_v8, %v156_v29  ;;  %v286_v44 = vmul.f32 %v684_v8, %v157_v30 }
  0x6d   :  { %535 = vst [vmem:[#allocation7 + $0x370] sm:$0xff] %v407_v34  ;;  %536 = vst [vmem:[#allocation7 + $0x378] sm:$0xff] %v408_v35  ;;  %v287_v45 = vmul.f32 %v684_v8, %v158_v31  ;;  %v409_v49 = vadd.f32 %v686_v9, %v280_v36  ;;  %v410_v50 = vadd.f32 %v686_v9, %v281_v37 }
  0x6e   :  { %v411_v51 = vadd.f32 %v686_v9, %v282_v38  ;;  %v412_v52 = vadd.f32 %v686_v9, %v283_v39  ;;  %v413_v56 = vadd.f32 %v686_v9, %v284_v42  ;;  %v414_v57 = vadd.f32 %v686_v9, %v285_v43 }
  0x6f   :  { %v415_v58 = vadd.f32 %v686_v9, %v286_v44  ;;  %v416_v59 = vadd.f32 %v686_v9, %v287_v45  ;;  %537 = vst [vmem:[#allocation7 + $0x380] sm:$0xff] %v409_v49  ;;  %538 = vst [vmem:[#allocation7 + $0x388] sm:$0xff] %v410_v50  ;;  %v288_v60 = vmul.f32 %v684_v8, %v159_v40 }
  0x70   :  { %539 = vst [vmem:[#allocation7 + $0x390] sm:$0xff] %v411_v51  ;;  %540 = vst [vmem:[#allocation7 + $0x398] sm:$0xff] %v412_v52  ;;  %v289_v61 = vmul.f32 %v684_v8, %v160_v41  ;;  %v290_v62 = vmul.f32 %v684_v8, %v161_v46  ;;  %v291_v63 = vmul.f32 %v684_v8, %v162_v47 }
  0x71   :  { %541 = vst [vmem:[#allocation7 + $0x3a0] sm:$0xff] %v413_v56  ;;  %542 = vst [vmem:[#allocation7 + $0x3a8] sm:$0xff] %v414_v57  ;;  %v292_v0 = vmul.f32 %v684_v8, %v163_v48  ;;  %v293_v1 = vmul.f32 %v684_v8, %v164_v53  ;;  %v294_v2 = vmul.f32 %v684_v8, %v165_v54 }
  0x72   :  { %543 = vst [vmem:[#allocation7 + $0x3b0] sm:$0xff] %v415_v58  ;;  %544 = vst [vmem:[#allocation7 + $0x3b8] sm:$0xff] %v416_v59  ;;  %v295_v3 = vmul.f32 %v684_v8, %v166_v55  ;;  %v417_v4 = vadd.f32 %v686_v9, %v288_v60  ;;  %v418_v5 = vadd.f32 %v686_v9, %v289_v61 }
  0x73   :  { %v419_v6 = vadd.f32 %v686_v9, %v290_v62  ;;  %v420_v7 = vadd.f32 %v686_v9, %v291_v63  ;;  %v421_v10 = vadd.f32 %v686_v9, %v292_v0  ;;  %v422_v11 = vadd.f32 %v686_v9, %v293_v1 }
  0x74   :  { %v423_v12 = vadd.f32 %v686_v9, %v294_v2  ;;  %v424_v13 = vadd.f32 %v686_v9, %v295_v3  ;;  %545 = vst [vmem:[#allocation7 + $0x3c0] sm:$0xff] %v417_v4  ;;  %546 = vst [vmem:[#allocation7 + $0x3c8] sm:$0xff] %v418_v5 }
  0x75   :  { %547 = vst [vmem:[#allocation7 + $0x3d0] sm:$0xff] %v419_v6  ;;  %548 = vst [vmem:[#allocation7 + $0x3d8] sm:$0xff] %v420_v7 }
  0x76   :  { %549 = vst [vmem:[#allocation7 + $0x3e0] sm:$0xff] %v421_v10  ;;  %550 = vst [vmem:[#allocation7 + $0x3e8] sm:$0xff] %v422_v11 }
  0x77   :  { %551 = vst [vmem:[#allocation7 + $0x3f0] sm:$0xff] %v423_v12  ;;  %552 = vst [vmem:[#allocation7 + $0x3f8] sm:$0xff] %v424_v13 }
  0x78   :  { %620 = shalt.err (!%p617_p1)
}
  0x79   :  { %s621_s10 = scalar_lea.hbm %s961_s2, 16384 }
  0x7a   :  { %p622_p2 = scmp.ne.s32.totalorder %s961_s2, %s621_s10  ;;  %p625_p3 = scmp.lt.u32.totalorder %s621_s10, %s961_s2 }
  0x7c   :  { %p627_p4 = pnand %p625_p3, %p622_p2 }
  0x7e   :  { %630 = shalt.err (!%p627_p4)
}
  0x7f   :  { %564 = dma.vmem_to_hbm [thread:$0]  %s559_s6, 16384, %s961_s2, [#allocation4], %s639_s0, %s639_s0, %s640_s29  }
  0x80   :  { %635 = dma.done.wait [#allocation4], 16384  }
  0x81   :  { %636 = vsyncadd [#allocation4], 4294950912 }
  0x82   :  { %568 = vsyncpa [#allocation3], 1 }
  0x83   :  { %569 = vsyncpa [#allocation4], 1 }
  0x84   :  { %570 = vsyncpa [#allocation5], 1 }

</bundles_post_ra>
